<compile_context>
chip_gen: v6e
topology: v6e:2x2x1
jax: 0.10.0
libtpu: 0.0.40
codegen_flags: <defaults>
</compile_context>

<pallas_src>
import math

import jax
import jax.numpy as jnp
from jax.experimental import pallas as pl
from jax.experimental.pallas import tpu as pltpu

EPS = 1e-5                      # RevIN epsilon
_INV_SQRT2 = 1.0 / math.sqrt(2.0)


def _erf_poly(z):
    """erf(z) via Abramowitz–Stegun 7.1.26 (max abs err 1.5e-7), exp/VPU only."""
    za = jnp.abs(z)
    t = 1.0 / (1.0 + 0.3275911 * za)
    poly = t * (0.254829592 +
                t * (-0.284496736 +
                     t * (1.421413741 +
                          t * (-1.453152027 + t * 1.061405429))))
    r = 1.0 - poly * jnp.exp(-za * za)
    return jnp.where(z < 0, -r, r)


def _model_kernel(x_ref, w_ref, b_ref, aff_ref, o_ref):
    # x_ref:   [B, L, N] f32   (native model layout — no transposes anywhere)
    # w_ref:   [B, L+P, L] f32 (rows 0..L-1: circulant-fused Linear^T, rows L..: Hidden1)
    # b_ref:   [1, L+P, 1] f32 (b_lin then b_hid, broadcast along sublanes)
    # aff_ref: [3, 1, N] f32   (affine_w, affine_b, 1/(affine_w+eps^2))
    # o_ref:   [B, P, N] f32
    L = w_ref.shape[2]

    x = x_ref[...]
    aw = aff_ref[0:1, :, :]                    # [1, 1, N]
    ab = aff_ref[1:2, :, :]
    inv_aw = aff_ref[2:3, :, :]

    # ---- RevIN 'norm' (stats over the time axis, per (b, n)) ----
    mean = jnp.mean(x, axis=1, keepdims=True)                  # [B, 1, N]
    var = jnp.mean((x - mean) ** 2, axis=1, keepdims=True)     # unbiased=False
    inv_std = jax.lax.rsqrt(var + EPS)                         # EUP, no divide
    std = (var + EPS) * inv_std                                # == sqrt(var + eps)
    xn = (x - mean) * inv_std * aw + ab                        # [B, L, N]

    w1 = w_ref[:, :L, :]                       # [B, L, L]
    w2 = w_ref[:, L:, :]                       # [B, P, L]
    b1 = b_ref[:, :L, :]                       # [1, L, 1]
    b2 = b_ref[:, L:, :]                       # [1, P, 1]

    # ---- circular conv (circulant) fused with Linear(seq_len, seq_len) ----
    y = jnp.einsum('bkl,bln->bkn', w1, xn,
                   preferred_element_type=jnp.float32) + b1    # [B, L, N]

    # ---- GELU (exact erf semantics, polynomial erf) ----
    y = 0.5 * y * (1.0 + _erf_poly(y * _INV_SQRT2))

    # ---- Hidden1: Linear(seq_len, pred_len) ----
    y = jnp.einsum('bpl,bln->bpn', w2, y,
                   preferred_element_type=jnp.float32) + b2    # [B, P, N]

    # ---- RevIN 'denorm' (same per-(b,n) stats; reciprocal precomputed) ----
    y = (y - ab) * inv_aw
    y = y * std + mean
    o_ref[...] = y


def prepare_params(W_lin, b_lin, W_hid, b_hid, w_filt, affine_w, affine_b, batch):
    """Run once: fold the circulant filter into the first Linear, pack all weights."""
    L = W_lin.shape[0]
    P = W_hid.shape[0]
    N = affine_w.shape[0]

    k = jnp.arange(L)
    idx = (k[None, :] - k[:, None]) % L                                  # [k, t]
    # Circulant equivalent of irfft(rfft(x)*rfft(w)) with norm='ortho'.
    circ = w_filt.reshape(L)[idx].astype(jnp.float32) * (1.0 / math.sqrt(L))
    # Exact fusion: x @ circ @ W_lin.T == x @ (circ @ W_lin.T).  Keep f32.
    cfused = jnp.dot(circ, W_lin.T.astype(jnp.float32),
                     preferred_element_type=jnp.float32)                 # [k_in, j_out]

    # Batched-LHS layout: w1[j_out, k_in] = cfused[k_in, j_out]; w2[p, j] = W_hid.
    w_flat = jnp.concatenate([cfused.T, W_hid.astype(jnp.float32)], axis=0)  # [L+P, L]
    w_packed = jnp.tile(w_flat[None], (batch, 1, 1))                         # [B, L+P, L]

    b_packed = jnp.concatenate([b_lin, b_hid]).reshape(1, L + P, 1).astype(jnp.float32)

    aff = jnp.stack([affine_w.astype(jnp.float32),
                     affine_b.astype(jnp.float32),
                     1.0 / (affine_w.astype(jnp.float32) + jnp.float32(EPS * EPS))])
    aff = aff.reshape(3, 1, N)
    return w_packed, b_packed, aff


@jax.jit
def model_forward(x, params):
    """x: [B, L, N] (batch, seq_len, enc_in) -> [B, P, N]. One kernel, no XLA shuffles."""
    w_packed, b_packed, aff = params
    B, L, N = x.shape
    P = w_packed.shape[1] - L

    return pl.pallas_call(
        _model_kernel,
        out_shape=jax.ShapeDtypeStruct((B, P, N), jnp.float32),
        in_specs=[pl.BlockSpec(memory_space=pltpu.MemorySpace.VMEM)] * 4,
        out_specs=pl.BlockSpec(memory_space=pltpu.MemorySpace.VMEM),
        compiler_params=pltpu.CompilerParams(vmem_limit_bytes=32 * 1024 * 1024),
    )(x.astype(jnp.float32), w_packed, b_packed, aff)


def reference(x, W_lin, b_lin, W_hid, b_hid, w_filt, affine_w, affine_b):
    """Pure-JAX reference using real FFTs (mirrors the PyTorch code)."""
    B, L, N = x.shape
    aw = affine_w.reshape(1, 1, N)
    ab = affine_b.reshape(1, 1, N)
    mean = jnp.mean(x, axis=1, keepdims=True)
    std = jnp.sqrt(jnp.var(x, axis=1, keepdims=True) + EPS)
    xn = (x - mean) / std * aw + ab
    x3 = jnp.transpose(xn, (0, 2, 1))                           # [B, N, L]
    Xf = jnp.fft.rfft(x3, axis=2, norm="ortho")
    Wf = jnp.fft.rfft(w_filt, axis=1, norm="ortho")
    y = jnp.fft.irfft(Xf * Wf, n=L, axis=2, norm="ortho")
    y = y @ W_lin.T + b_lin
    y = 0.5 * y * (1.0 + jax.lax.erf(y / jnp.sqrt(2.0)))
    y = y @ W_hid.T + b_hid
    y = jnp.transpose(y, (0, 2, 1))                             # [B, P, N]
    y = (y - ab) / (aw + EPS * EPS)
    y = y * std + mean
    return y


if __name__ == "__main__":
    # Small shapes consistent with the module: batch=2, enc_in=4,
    # seq_len=32, pred_len=16. Input is [B, seq_len, enc_in].
    B, L, N, P = 2, 32, 4, 16

    key = jax.random.PRNGKey(0)
    kx, k1, k2, k3, k4, k5 = jax.random.split(key, 6)

    x = jax.random.normal(kx, (B, L, N), jnp.float32)

    # Deterministic parameter init (shapes from Model.__init__).
    bound = 1.0 / math.sqrt(L)
    W_lin = jax.random.uniform(k1, (L, L), jnp.float32, -bound, bound)   # Linear.weight
    b_lin = jax.random.uniform(k2, (L,), jnp.float32, -bound, bound)     # Linear.bias
    W_hid = jax.random.uniform(k3, (P, L), jnp.float32, -bound, bound)   # Hidden1.weight
    b_hid = jax.random.uniform(k4, (P,), jnp.float32, -bound, bound)     # Hidden1.bias
    w_filt = 0.02 * jax.random.normal(k5, (1, L), jnp.float32)           # self.w
    affine_w = jnp.ones((N,), jnp.float32)    # RevIN affine_weight default init
    affine_b = jnp.zeros((N,), jnp.float32)   # RevIN affine_bias default init

    params = prepare_params(W_lin, b_lin, W_hid, b_hid, w_filt,
                            affine_w, affine_b, batch=B)

    out = model_forward(x, params)
    out = jax.block_until_ready(out)

    ref = reference(x, W_lin, b_lin, W_hid, b_hid, w_filt, affine_w, affine_b)
    assert out.shape == (B, P, N), out.shape
    assert jnp.allclose(out, ref, atol=2e-3, rtol=2e-3), float(jnp.abs(out - ref).max())

    print("KERNEL_OK")
</pallas_src>

<mosaic_0001>
module attributes {stable_mosaic.version = 11 : i64} {
  func.func @_model_kernel(%arg0: memref<2x32x4xf32, #tpu.memory_space<vmem>>, %arg1: memref<2x48x32xf32, #tpu.memory_space<vmem>>, %arg2: memref<1x48x1xf32, #tpu.memory_space<vmem>>, %arg3: memref<3x1x4xf32, #tpu.memory_space<vmem>>, %arg4: memref<2x16x4xf32, #tpu.memory_space<vmem>>) attributes {dimension_semantics = [], scalar_prefetch = 0 : i64, scratch_operands = 0 : i64, tpu.core_type = #tpu.core_type<tc>} {
    %c0 = arith.constant 0 : index
    %c0_0 = arith.constant 0 : index
    %c0_1 = arith.constant 0 : index
    %0 = vector.load %arg0[%c0, %c0_0, %c0_1] : memref<2x32x4xf32, #tpu.memory_space<vmem>>, vector<2x32x4xf32>
    %c0_2 = arith.constant 0 : index
    %c0_3 = arith.constant 0 : index
    %c0_4 = arith.constant 0 : index
    %1 = vector.load %arg3[%c0_2, %c0_3, %c0_4] : memref<3x1x4xf32, #tpu.memory_space<vmem>>, vector<1x1x4xf32>
    %c1 = arith.constant 1 : index
    %c0_5 = arith.constant 0 : index
    %c0_6 = arith.constant 0 : index
    %2 = vector.load %arg3[%c1, %c0_5, %c0_6] : memref<3x1x4xf32, #tpu.memory_space<vmem>>, vector<1x1x4xf32>
    %c2 = arith.constant 2 : index
    %c0_7 = arith.constant 0 : index
    %c0_8 = arith.constant 0 : index
    %3 = vector.load %arg3[%c2, %c0_7, %c0_8] : memref<3x1x4xf32, #tpu.memory_space<vmem>>, vector<1x1x4xf32>
    %cst = arith.constant dense<0.000000e+00> : vector<2x4xf32>
    %4 = vector.multi_reduction <add>, %0, %cst [1] : vector<2x32x4xf32> to vector<2x4xf32>
    %5 = vector.shape_cast %4 : vector<2x4xf32> to vector<2x1x4xf32>
    %cst_9 = arith.constant 3.200000e+01 : f32
    %6 = vector.broadcast %cst_9 : f32 to vector<2x1x4xf32>
    %7 = arith.divf %5, %6 : vector<2x1x4xf32>
    %8 = vector.broadcast %7 : vector<2x1x4xf32> to vector<2x32x4xf32>
    %9 = arith.subf %0, %8 : vector<2x32x4xf32>
    %10 = arith.mulf %9, %9 : vector<2x32x4xf32>
    %cst_10 = arith.constant dense<0.000000e+00> : vector<2x4xf32>
    %11 = vector.multi_reduction <add>, %10, %cst_10 [1] : vector<2x32x4xf32> to vector<2x4xf32>
    %12 = vector.shape_cast %11 : vector<2x4xf32> to vector<2x1x4xf32>
    %cst_11 = arith.constant 3.200000e+01 : f32
    %13 = vector.broadcast %cst_11 : f32 to vector<2x1x4xf32>
    %14 = arith.divf %12, %13 : vector<2x1x4xf32>
    %cst_12 = arith.constant 9.99999974E-6 : f32
    %15 = vector.broadcast %cst_12 : f32 to vector<2x1x4xf32>
    %16 = arith.addf %14, %15 : vector<2x1x4xf32>
    %17 = math.rsqrt %16 : vector<2x1x4xf32>
    %cst_13 = arith.constant 9.99999974E-6 : f32
    %18 = vector.broadcast %cst_13 : f32 to vector<2x1x4xf32>
    %19 = arith.addf %14, %18 : vector<2x1x4xf32>
    %20 = arith.mulf %19, %17 : vector<2x1x4xf32>
    %21 = vector.broadcast %7 : vector<2x1x4xf32> to vector<2x32x4xf32>
    %22 = arith.subf %0, %21 : vector<2x32x4xf32>
    %23 = vector.broadcast %17 : vector<2x1x4xf32> to vector<2x32x4xf32>
    %24 = arith.mulf %22, %23 : vector<2x32x4xf32>
    %25 = vector.broadcast %1 : vector<1x1x4xf32> to vector<2x32x4xf32>
    %26 = arith.mulf %24, %25 : vector<2x32x4xf32>
    %27 = vector.broadcast %2 : vector<1x1x4xf32> to vector<2x32x4xf32>
    %28 = arith.addf %26, %27 : vector<2x32x4xf32>
    %c0_14 = arith.constant 0 : index
    %c0_15 = arith.constant 0 : index
    %c0_16 = arith.constant 0 : index
    %29 = vector.load %arg1[%c0_14, %c0_15, %c0_16] : memref<2x48x32xf32, #tpu.memory_space<vmem>>, vector<2x32x32xf32>
    %c0_17 = arith.constant 0 : index
    %c32 = arith.constant 32 : index
    %c0_18 = arith.constant 0 : index
    %30 = vector.load %arg1[%c0_17, %c32, %c0_18] : memref<2x48x32xf32, #tpu.memory_space<vmem>>, vector<2x16x32xf32>
    %c0_19 = arith.constant 0 : index
    %c0_20 = arith.constant 0 : index
    %c0_21 = arith.constant 0 : index
    %31 = vector.load %arg2[%c0_19, %c0_20, %c0_21] : memref<1x48x1xf32, #tpu.memory_space<vmem>>, vector<1x32x1xf32>
    %c0_22 = arith.constant 0 : index
    %c32_23 = arith.constant 32 : index
    %c0_24 = arith.constant 0 : index
    %32 = vector.load %arg2[%c0_22, %c32_23, %c0_24] : memref<1x48x1xf32, #tpu.memory_space<vmem>>, vector<1x16x1xf32>
    "tpu.trace_start"() <{level = 10 : i32, message = "bkl,bln->bkn"}> : () -> ()
    %cst_25 = arith.constant dense<0.000000e+00> : vector<2x32x4xf32>
    %33 = tpu.matmul %29, %28, %cst_25 {dimension_numbers = #tpu.dot_dimension_numbers<[2], [1], [1], [2], [0, 0, 0, 1, 1, 2], [0], [0]>} : vector<2x32x32xf32>, vector<2x32x4xf32>, vector<2x32x4xf32> -> vector<2x32x4xf32>
    "tpu.trace_stop"() : () -> ()
    %34 = vector.broadcast %31 : vector<1x32x1xf32> to vector<2x32x4xf32>
    %35 = arith.addf %33, %34 : vector<2x32x4xf32>
    %cst_26 = arith.constant 5.000000e-01 : f32
    %36 = vector.broadcast %cst_26 : f32 to vector<2x32x4xf32>
    %37 = arith.mulf %36, %35 : vector<2x32x4xf32>
    %cst_27 = arith.constant 0.707106769 : f32
    %38 = vector.broadcast %cst_27 : f32 to vector<2x32x4xf32>
    %39 = arith.mulf %35, %38 : vector<2x32x4xf32>
    %40 = math.absf %39 : vector<2x32x4xf32>
    %cst_28 = arith.constant 0.327591091 : f32
    %41 = vector.broadcast %cst_28 : f32 to vector<2x32x4xf32>
    %42 = arith.mulf %41, %40 : vector<2x32x4xf32>
    %cst_29 = arith.constant 1.000000e+00 : f32
    %43 = vector.broadcast %cst_29 : f32 to vector<2x32x4xf32>
    %44 = arith.addf %43, %42 : vector<2x32x4xf32>
    %cst_30 = arith.constant 1.000000e+00 : f32
    %45 = vector.broadcast %cst_30 : f32 to vector<2x32x4xf32>
    %46 = arith.divf %45, %44 : vector<2x32x4xf32>
    %cst_31 = arith.constant 1.06140542 : f32
    %47 = vector.broadcast %cst_31 : f32 to vector<2x32x4xf32>
    %48 = arith.mulf %46, %47 : vector<2x32x4xf32>
    %cst_32 = arith.constant -1.45315206 : f32
    %49 = vector.broadcast %cst_32 : f32 to vector<2x32x4xf32>
    %50 = arith.addf %49, %48 : vector<2x32x4xf32>
    %51 = arith.mulf %46, %50 : vector<2x32x4xf32>
    %cst_33 = arith.constant 1.42141378 : f32
    %52 = vector.broadcast %cst_33 : f32 to vector<2x32x4xf32>
    %53 = arith.addf %52, %51 : vector<2x32x4xf32>
    %54 = arith.mulf %46, %53 : vector<2x32x4xf32>
    %cst_34 = arith.constant -0.284496725 : f32
    %55 = vector.broadcast %cst_34 : f32 to vector<2x32x4xf32>
    %56 = arith.addf %55, %54 : vector<2x32x4xf32>
    %57 = arith.mulf %46, %56 : vector<2x32x4xf32>
    %cst_35 = arith.constant 0.254829586 : f32
    %58 = vector.broadcast %cst_35 : f32 to vector<2x32x4xf32>
    %59 = arith.addf %58, %57 : vector<2x32x4xf32>
    %60 = arith.mulf %46, %59 : vector<2x32x4xf32>
    %cst_36 = arith.constant 0.000000e+00 : f32
    %61 = vector.broadcast %cst_36 : f32 to vector<2x32x4xf32>
    %62 = arith.subf %61, %40 : vector<2x32x4xf32>
    %63 = arith.mulf %62, %40 : vector<2x32x4xf32>
    %64 = math.exp %63 : vector<2x32x4xf32>
    %65 = arith.mulf %60, %64 : vector<2x32x4xf32>
    %cst_37 = arith.constant 1.000000e+00 : f32
    %66 = vector.broadcast %cst_37 : f32 to vector<2x32x4xf32>
    %67 = arith.subf %66, %65 : vector<2x32x4xf32>
    %cst_38 = arith.constant 0.000000e+00 : f32
    %68 = vector.broadcast %cst_38 : f32 to vector<2x32x4xf32>
    %69 = arith.cmpf olt, %39, %68 : vector<2x32x4xf32>
    %cst_39 = arith.constant 0.000000e+00 : f32
    %70 = vector.broadcast %cst_39 : f32 to vector<2x32x4xf32>
    %71 = arith.subf %70, %67 : vector<2x32x4xf32>
    %72 = arith.select %69, %71, %67 : vector<2x32x4xi1>, vector<2x32x4xf32>
    %cst_40 = arith.constant 1.000000e+00 : f32
    %73 = vector.broadcast %cst_40 : f32 to vector<2x32x4xf32>
    %74 = arith.addf %73, %72 : vector<2x32x4xf32>
    %75 = arith.mulf %37, %74 : vector<2x32x4xf32>
    "tpu.trace_start"() <{level = 10 : i32, message = "bpl,bln->bpn"}> : () -> ()
    %cst_41 = arith.constant dense<0.000000e+00> : vector<2x16x4xf32>
    %76 = tpu.matmul %30, %75, %cst_41 {dimension_numbers = #tpu.dot_dimension_numbers<[2], [1], [1], [2], [0, 0, 0, 1, 1, 2], [0], [0]>} : vector<2x16x32xf32>, vector<2x32x4xf32>, vector<2x16x4xf32> -> vector<2x16x4xf32>
    "tpu.trace_stop"() : () -> ()
    %77 = vector.broadcast %32 : vector<1x16x1xf32> to vector<2x16x4xf32>
    %78 = arith.addf %76, %77 : vector<2x16x4xf32>
    %79 = vector.broadcast %2 : vector<1x1x4xf32> to vector<2x16x4xf32>
    %80 = arith.subf %78, %79 : vector<2x16x4xf32>
    %81 = vector.broadcast %3 : vector<1x1x4xf32> to vector<2x16x4xf32>
    %82 = arith.mulf %80, %81 : vector<2x16x4xf32>
    %83 = vector.broadcast %20 : vector<2x1x4xf32> to vector<2x16x4xf32>
    %84 = arith.mulf %82, %83 : vector<2x16x4xf32>
    %85 = vector.broadcast %7 : vector<2x1x4xf32> to vector<2x16x4xf32>
    %86 = arith.addf %84, %85 : vector<2x16x4xf32>
    %c0_42 = arith.constant 0 : index
    %c0_43 = arith.constant 0 : index
    %c0_44 = arith.constant 0 : index
    %87 = vector.load %arg4[%c0_42, %c0_43, %c0_44] : memref<2x16x4xf32, #tpu.memory_space<vmem>>, vector<2x16x4xf32>
    tpu.vector_store %arg4[%c0_42, %c0_43, %c0_44], %86 {strides = array<i32>} : memref<2x16x4xf32, #tpu.memory_space<vmem>>, vector<2x16x4xf32>,
    return
  }
}

</mosaic_0001>

<bundles_post_ra>
// kernel: model_forward.1
= control target key start
LH: loop header
LB: loop body
LE: loop exit
PB: predicated region body
PF: predicated region fallthrough
CT: control target
= control target key end

     0   :  { %vm30_vm0 = vcmask 31744   ;;  %v931_v3 = vmov 0   ;;  %vm184_vm1 = vcmask 261120   ;;  %s1268_s0 = inlined_call_operand.vmem [shape: f32[2,32,4], index: 0, kind: input, shape index: {}]   ;;  %s1269_s1 = inlined_call_operand.vmem [shape: f32[2,48,32], index: 1, kind: input, shape index: {}]   ;;  %s1270_s2 = inlined_call_operand.vmem [shape: f32[1,48,1], index: 2, kind: input, shape index: {}]   ;;  %s1271_s3 = inlined_call_operand.vmem [shape: f32[3,1,4], index: 3, kind: input, shape index: {}]   ;;  %s1272_s4 = inlined_call_operand.vmem [shape: f32[2,16,4], index: 4, kind: output, shape index: {}]  }
   0x1   :  { %v17_v0 = vld [vmem:[%s1268_s0] sm:$0xff]  ;;  %v18_v1 = vld [vmem:[%s1268_s0 + $0x8] sm:$0xff]  ;;  %v19_v2 = vld [vmem:[%s1268_s0 + $0x10] sm:$0xff]  ;;  %893 = vset.pattern.permute.xlu0 %v931_v3  ;;  %894 = vset.pattern.permute.xlu1 %v931_v3 }
   0x2   :  { %v20_v4 = vld [vmem:[%s1268_s0 + $0x18] sm:$0xff]  ;;  %v31_v5 = vsel %vm30_vm0, %v17_v0, 0.0  ;;  %v32_v6 = vsel %vm30_vm0, %v18_v1, 0.0  ;;  %v34_v7 = vsel %vm30_vm0, %v19_v2, 0.0  ;;  %v21_v8 = vld [vmem:[%s1268_s0 + $0x20] sm:$0xff]  ;;  %v22_v9 = vld [vmem:[%s1268_s0 + $0x28] sm:$0xff] }
   0x3   :  { %v23_v10 = vld [vmem:[%s1268_s0 + $0x30] sm:$0xff]  ;;  %v33_v11 = vadd.f32 %v32_v6, %v31_v5  ;;  %v24_v12 = vld [vmem:[%s1268_s0 + $0x38] sm:$0xff]  ;;  %v44_v13 = vsel %vm30_vm0, %v21_v8, 0.0  ;;  %v45_v14 = vsel %vm30_vm0, %v22_v9, 0.0  ;;  %v146_v16 = vld [vmem:[%s1269_s1] sm:$0xff]  ;;  %v36_v18 = vsel %vm30_vm0, %v20_v4, 0.0 }
   0x4   :  { %v47_v15 = vsel %vm30_vm0, %v23_v10, 0.0  ;;  %v150_v17 = vld [vmem:[%s1269_s1 + $0x30] sm:$0xff]  ;;  %v46_v19 = vadd.f32 %v45_v14, %v44_v13  ;;  %850 = vmatprep.mubr.msk.f32.mxu0 %vm184_vm1, %v146_v16  ;;  %v49_v21 = vsel %vm30_vm0, %v24_v12, 0.0  ;;  %v161_v23 = vld [vmem:[%s1270_s2 + $0x18] sm:$0xff]  ;;  %v159_v24 = vld [vmem:[%s1270_s2 + $0x8] sm:$0xff] }
   0x5   :  { %864 = vmatprep.mubr.msk.f32.mxu1 %vm184_vm1, %v150_v17  ;;  %v35_v20 = vadd.f32 %v34_v7, %v33_v11  ;;  %181 = vperm.xlu0 %893, %v161_v23   ;;  %v160_v27 = vld [vmem:[%s1270_s2 + $0x10] sm:$0xff]  ;;  %v158_v28 = vld [vmem:[%s1270_s2] sm:$0xff]  ;;  %v163_v34 = vld [vmem:[%s1270_s2 + $0x28] sm:$0xff] }
   0x6   :  { %v48_v22 = vadd.f32 %v47_v15, %v46_v19  ;;  %171 = vperm.xlu1 %894, %v159_v24   ;;  %v162_v33 = vld [vmem:[%s1270_s2 + $0x20] sm:$0xff] }
   0x7   :  { %v37_v25 = vadd.f32 %v36_v18, %v35_v20 }
   0x8   :  { %v50_v26 = vadd.f32 %v49_v21, %v48_v22 }
   0x9   :  { %v38_v29 = vrot.slane %v37_v25, 4  ;;  %176 = vperm.xlu0 %893, %v160_v27  }
   0xa   :  { %v51_v30 = vrot.slane %v50_v26, 4  ;;  %166 = vperm.xlu1 %894, %v158_v28   ;;  %v799_v28 = vld [vmem:[%s1271_s3] ss:$0 sm:$0xff] }
   0xb   :  { %v39_v31 = vadd.f32 %v38_v29, %v37_v25 }
   0xc   :  { %v52_v32 = vadd.f32 %v51_v30, %v50_v26 }
   0xd   :  { %v40_v35 = vrot.slane %v39_v31, 2  ;;  %597 = vperm.xlu0 %893, %v162_v33  }
   0xe   :  { %v53_v36 = vrot.slane %v52_v32, 2  ;;  %602 = vperm.xlu1 %894, %v163_v34   ;;  %v1055_v34 = vld [vmem:[%s1271_s3 + $0x1] ss:$0 sm:$0xff] }
   0xf   :  { %v41_v37 = vadd.f32 %v40_v35, %v39_v31 }
  0x10   :  { %v54_v38 = vadd.f32 %v53_v36, %v52_v32 }
  0x11   :  { %v42_v39 = vrot.slane %v41_v37, 1 }
  0x12   :  { %v55_v40 = vrot.slane %v54_v38, 1 }
  0x13   :  { %v43_v41 = vadd.f32 %v42_v39, %v41_v37 }
  0x14   :  { %v56_v42 = vadd.f32 %v55_v40, %v54_v38 }
  0x15   :  { %v1015_v43 = vmul.f32 0.03125, %v43_v41 }
  0x16   :  { %v1017_v44 = vmul.f32 0.03125, %v56_v42 }
  0x17   :  { %v60_v45 = vsub.f32 %v17_v0, %v1015_v43  ;;  %v61_v46 = vsub.f32 %v18_v1, %v1015_v43  ;;  %v62_v47 = vsub.f32 %v19_v2, %v1015_v43  ;;  %v63_v48 = vsub.f32 %v20_v4, %v1015_v43 }
  0x18   :  { %v64_v49 = vsub.f32 %v21_v8, %v1017_v44  ;;  %v65_v50 = vsub.f32 %v22_v9, %v1017_v44  ;;  %v66_v51 = vsub.f32 %v23_v10, %v1017_v44  ;;  %v67_v52 = vsub.f32 %v24_v12, %v1017_v44 }
  0x19   :  { %v68_v53 = vmul.f32 %v60_v45, %v60_v45  ;;  %v69_v54 = vmul.f32 %v61_v46, %v61_v46  ;;  %v70_v55 = vmul.f32 %v62_v47, %v62_v47  ;;  %v71_v56 = vmul.f32 %v63_v48, %v63_v48 }
  0x1a   :  { %v72_v57 = vmul.f32 %v64_v49, %v64_v49  ;;  %v73_v58 = vmul.f32 %v65_v50, %v65_v50  ;;  %v74_v59 = vmul.f32 %v66_v51, %v66_v51  ;;  %v75_v60 = vmul.f32 %v67_v52, %v67_v52 }
  0x1b   :  { %v76_v61 = vsel %vm30_vm0, %v68_v53, 0.0  ;;  %v77_v62 = vsel %vm30_vm0, %v69_v54, 0.0  ;;  %v79_v63 = vsel %vm30_vm0, %v70_v55, 0.0  ;;  %v81_v4 = vsel %vm30_vm0, %v71_v56, 0.0 }
  0x1c   :  { %v78_v0 = vadd.f32 %v77_v62, %v76_v61  ;;  %v89_v1 = vsel %vm30_vm0, %v72_v57, 0.0  ;;  %v90_v2 = vsel %vm30_vm0, %v73_v58, 0.0  ;;  %v92_v3 = vsel %vm30_vm0, %v74_v59, 0.0  ;;  %v147_v57 = vld [vmem:[%s1269_s1 + $0x8] sm:$0xff]  ;;  %v151_v58 = vld [vmem:[%s1269_s1 + $0x38] sm:$0xff]  ;;  %v148_v59 = vld [vmem:[%s1269_s1 + $0x10] sm:$0xff] }
  0x1d   :  { %v91_v5 = vadd.f32 %v90_v2, %v89_v1  ;;  %v94_v7 = vsel %vm30_vm0, %v75_v60, 0.0  ;;  %v152_v60 = vld [vmem:[%s1269_s1 + $0x40] sm:$0xff]  ;;  %v149_v61 = vld [vmem:[%s1269_s1 + $0x18] sm:$0xff]  ;;  %v153_v62 = vld [vmem:[%s1269_s1 + $0x48] sm:$0xff] }
  0x1e   :  { %v80_v6 = vadd.f32 %v79_v63, %v78_v0  ;;  %v154_v63 = vld [vmem:[%s1269_s1 + $0x20] sm:$0xff]  ;;  %v156_v0 = vld [vmem:[%s1269_s1 + $0x50] sm:$0xff] }
  0x1f   :  { %v93_v8 = vadd.f32 %v92_v3, %v91_v5 }
  0x20   :  { %v82_v9 = vadd.f32 %v81_v4, %v80_v6 }
  0x21   :  { %v95_v10 = vadd.f32 %v94_v7, %v93_v8 }
  0x22   :  { %v83_v11 = vrot.slane %v82_v9, 4 }
  0x23   :  { %v96_v12 = vrot.slane %v95_v10, 4 }
  0x24   :  { %v84_v13 = vadd.f32 %v83_v11, %v82_v9 }
  0x25   :  { %v97_v14 = vadd.f32 %v96_v12, %v95_v10 }
  0x26   :  { %v85_v15 = vrot.slane %v84_v13, 2 }
  0x27   :  { %v98_v16 = vrot.slane %v97_v14, 2 }
  0x28   :  { %v86_v17 = vadd.f32 %v85_v15, %v84_v13 }
  0x29   :  { %v99_v18 = vadd.f32 %v98_v16, %v97_v14 }
  0x2a   :  { %v87_v19 = vrot.slane %v86_v17, 1 }
  0x2b   :  { %v100_v20 = vrot.slane %v99_v18, 1 }
  0x2c   :  { %v88_v21 = vadd.f32 %v87_v19, %v86_v17 }
  0x2d   :  { %v101_v22 = vadd.f32 %v100_v20, %v99_v18 }
  0x2e   :  { %v102_v23 = vmul.f32 0.03125, %v88_v21 }
  0x2f   :  { %v103_v24 = vmul.f32 0.03125, %v101_v22 }
  0x30   :  { %v1035_v25 = vadd.f32 1e-05, %v102_v23 }
  0x31   :  { %v1037_v26 = vadd.f32 1e-05, %v103_v24 }
  0x32   :  { %895 = vrsqrt.f32 %v1035_v25 }
  0x33   :  { %897 = vrsqrt.f32 %v1037_v26 }
  0x3f   :  { %v1041_v27 = vpop.eup %895 }
  0x40   :  { %v1046_v29 = vpop.eup %897  ;;  %v113_v30 = vmul.f32 %v1041_v27, %v63_v48  ;;  %v112_v31 = vmul.f32 %v1041_v27, %v62_v47  ;;  %v111_v32 = vmul.f32 %v1041_v27, %v61_v46  ;;  %v110_v33 = vmul.f32 %v1041_v27, %v60_v45 }
  0x41   :  { %v117_v35 = vmul.f32 %v1046_v29, %v67_v52  ;;  %v116_v36 = vmul.f32 %v1046_v29, %v66_v51  ;;  %v115_v37 = vmul.f32 %v1046_v29, %v65_v50  ;;  %v114_v38 = vmul.f32 %v1046_v29, %v64_v49 }
  0x42   :  { %v127_v39 = vmul.f32 %v799_v28, %v113_v30  ;;  %v126_v40 = vmul.f32 %v799_v28, %v112_v31  ;;  %v125_v41 = vmul.f32 %v799_v28, %v111_v32  ;;  %v124_v53 = vmul.f32 %v799_v28, %v110_v33 }
  0x43   :  { %v131_v42 = vmul.f32 %v799_v28, %v117_v35  ;;  %v130_v46 = vmul.f32 %v799_v28, %v116_v36  ;;  %v129_v47 = vmul.f32 %v799_v28, %v115_v37  ;;  %v128_v51 = vmul.f32 %v799_v28, %v114_v38 }
  0x44   :  { %v141_v45 = vadd.f32 %v1055_v34, %v127_v39  ;;  %v140_v48 = vadd.f32 %v1055_v34, %v126_v40  ;;  %v139_v50 = vadd.f32 %v1055_v34, %v125_v41  ;;  %v138_v55 = vadd.f32 %v1055_v34, %v124_v53 }
  0x45   :  { %v145_v54 = vadd.f32 %v1055_v34, %v131_v42  ;;  %v144_v52 = vadd.f32 %v1055_v34, %v130_v46  ;;  %v143_v49 = vadd.f32 %v1055_v34, %v129_v47  ;;  %v142_v56 = vadd.f32 %v1055_v34, %v128_v51 }
  0x46   :  { %842 = vmatprep.subr.mxu0 %v141_v45 }
  0x47   :  { %856 = vmatprep.subr.mxu1 %v145_v54  ;;  %843 = vmatpush3.msra.mxu0 %v141_v45 }
  0x48   :  { %857 = vmatpush3.msra.mxu1 %v145_v54  ;;  %844 = vmatprep.subr.mxu0 %v140_v48 }
  0x49   :  { %858 = vmatprep.subr.mxu1 %v144_v52  ;;  %845 = vmatpush3.msra.mxu0 %v140_v48 }
  0x4a   :  { %859 = vmatpush3.msra.mxu1 %v144_v52  ;;  %846 = vmatprep.subr.mxu0 %v139_v50 }
  0x4b   :  { %860 = vmatprep.subr.mxu1 %v143_v49  ;;  %847 = vmatpush3.msra.mxu0 %v139_v50 }
  0x4c   :  { %861 = vmatpush3.msra.mxu1 %v143_v49  ;;  %848 = vmatprep.subr.mxu0 %v138_v55 }
  0x4d   :  { %862 = vmatprep.subr.mxu1 %v142_v56  ;;  %849 = vmatpush3.msra.mxu0 %v138_v55 }
  0x4e   :  { %863 = vmatpush3.msra.mxu1 %v142_v56  ;;  %851 = vmatmul.mubr.msk.f32.vlgmr.msra.gmra.mxu0 %vm184_vm1, %v147_v57 }
  0x4f   :  { %865 = vmatmul.mubr.msk.f32.vlgmr.msra.gmra.mxu1 %vm184_vm1, %v151_v58  ;;  %853 = vmatprep.mubr.msk.f32.mxu0 %vm184_vm1, %v148_v59 }
  0x50   :  { %867 = vmatprep.mubr.msk.f32.mxu1 %vm184_vm1, %v152_v60 }
  0x52   :  { %854 = vmatmul.mubr.msk.f32.gmra.mxu0 %vm184_vm1, %v149_v61 }
  0x53   :  { %868 = vmatmul.mubr.msk.f32.gmra.mxu1 %vm184_vm1, %v153_v62  ;;  %878 = vmatprep.mubr.msk.f32.mxu0 %vm184_vm1, %v154_v63 }
  0x54   :  { %889 = vmatprep.mubr.msk.f32.mxu1 %vm184_vm1, %v156_v0 }
  0x80   :  { %v182_v17 = vpop.permute.xlu0 %181 }
  0x81   :  { %v172_v1 = vpop.permute.xlu1 %171 }
  0x84   :  { %v177_v36 = vpop.permute.xlu0 %176 }
  0x85   :  { %v167_v3 = vpop.permute.xlu1 %166 }
 0x10e   :  { %v852_v2 = vpop.f32.mrf.mxu0 }
 0x10f   :  { %v1101_v4 = vadd.f32 %v852_v2, %v172_v1  ;;  %v866_v5 = vpop.f32.mrf.mxu1 }
 0x110   :  { %v1103_v6 = vadd.f32 %v866_v5, %v172_v1  ;;  %v263_v7 = vpop.f32.mrf.mxu0 }
 0x111   :  { %v1106_v8 = vmul.f32 0.70710677, %v1101_v4  ;;  %v1108_v9 = vadd.f32 %v263_v7, %v167_v3  ;;  %v360_v10 = vpop.f32.mrf.mxu1 }
 0x112   :  { %v1111_v11 = vmul.f32 0.70710677, %v1103_v6  ;;  %v1113_v12 = vadd.f32 %v360_v10, %v167_v3  ;;  %v855_v20 = vpop.f32.mrf.mxu0 }
 0x113   :  { %v396_v13 = vand.u32 2147483647, %v1106_v8  ;;  %v1117_v14 = vmul.f32 0.70710677, %v1108_v9  ;;  %v869_v23 = vpop.f32.mrf.mxu1  ;;  %v1125_v38 = vadd.f32 %v855_v20, %v182_v17  ;;  %vm556_vm2 = vcmp.lt.f32.partialorder %v1106_v8, 0.0 }
 0x114   :  { %v400_v15 = vand.u32 2147483647, %v1111_v11  ;;  %v1121_v16 = vmul.f32 0.70710677, %v1113_v12  ;;  %v273_v33 = vpop.f32.mrf.mxu0  ;;  %v1127_v39 = vadd.f32 %v869_v23, %v182_v17  ;;  %vm560_vm3 = vcmp.lt.f32.partialorder %v1111_v11, 0.0 }
 0x115   :  { %v404_v18 = vmul.f32 0.3275911, %v396_v13  ;;  %v395_v19 = vand.u32 2147483647, %v1117_v14  ;;  %v370_v35 = vpop.f32.mrf.mxu1  ;;  %v1129_v40 = vadd.f32 %v273_v33, %v177_v36  ;;  %v1132_v41 = vmul.f32 0.70710677, %v1125_v38 }
 0x116   :  { %v408_v21 = vmul.f32 0.3275911, %v400_v15  ;;  %v399_v22 = vand.u32 2147483647, %v1121_v16  ;;  %v1134_v42 = vadd.f32 %v370_v35, %v177_v36  ;;  %v1137_v46 = vmul.f32 0.70710677, %v1127_v39 }
 0x117   :  { %v412_v24 = vadd.f32 1.0, %v404_v18  ;;  %v403_v28 = vmul.f32 0.3275911, %v395_v19  ;;  %v1140_v47 = vmul.f32 0.70710677, %v1129_v40  ;;  %v508_v56 = vsub.f32 0.0, %v396_v13 }
 0x118   :  { %v416_v30 = vadd.f32 1.0, %v408_v21  ;;  %v407_v31 = vmul.f32 0.3275911, %v399_v22  ;;  %v398_v45 = vand.u32 2147483647, %v1132_v41  ;;  %v512_v61 = vsub.f32 0.0, %v400_v15 }
 0x119   :  { %899 = vrcp.f32 %v412_v24  ;;  %v411_v32 = vadd.f32 1.0, %v403_v28  ;;  %v402_v48 = vand.u32 2147483647, %v1137_v46  ;;  %v397_v53 = vand.u32 2147483647, %v1140_v47 }
 0x11a   :  { %901 = vrcp.f32 %v416_v30  ;;  %v415_v37 = vadd.f32 1.0, %v407_v31  ;;  %v406_v54 = vmul.f32 0.3275911, %v398_v45  ;;  %v1146_v52 = vmul.f32 0.70710677, %v1134_v42 }
 0x11b   :  { %903 = vrcp.f32 %v411_v32  ;;  %v410_v51 = vmul.f32 0.3275911, %v402_v48  ;;  %v405_v50 = vmul.f32 0.3275911, %v397_v53  ;;  %v516_v1 = vmul.f32 %v508_v56, %v396_v13 }
 0x11c   :  { %905 = vrcp.f32 %v415_v37  ;;  %v414_v49 = vadd.f32 1.0, %v406_v54  ;;  %v401_v55 = vand.u32 2147483647, %v1146_v52  ;;  %v507_v2 = vsub.f32 0.0, %v395_v19 }
 0x11d   :  { %v418_v57 = vadd.f32 1.0, %v410_v51  ;;  %v413_v58 = vadd.f32 1.0, %v405_v50  ;;  %v511_v5 = vsub.f32 0.0, %v399_v22  ;;  %v520_v17 = vmul.f32 %v512_v61, %v400_v15 }
 0x11e   :  { %907 = vrcp.f32 %v414_v49  ;;  %v409_v59 = vmul.f32 0.3275911, %v401_v55  ;;  %v510_v18 = vsub.f32 0.0, %v398_v45  ;;  %v514_v21 = vsub.f32 0.0, %v402_v48 }
 0x11f   :  { %909 = vrcp.f32 %v418_v57  ;;  %v525_v13 = vmul.f32 1.442695, %v516_v1  ;;  %v515_v30 = vmul.f32 %v507_v2, %v395_v19  ;;  %v519_v32 = vmul.f32 %v511_v5, %v399_v22 }
 0x120   :  { %v417_v63 = vadd.f32 1.0, %v409_v59  ;;  %911 = vrcp.f32 %v413_v58  ;;  %v533_v15 = vmul.f32 1.442695, %v520_v17  ;;  %v518_v37 = vmul.f32 %v510_v18, %v398_v45 }
 0x121   :  { %v509_v54 = vsub.f32 0.0, %v397_v53  ;;  %v522_v50 = vmul.f32 %v514_v21, %v402_v48  ;;  %v523_v58 = vmul.f32 1.442695, %v515_v30  ;;  %v513_v19 = vsub.f32 0.0, %v401_v55 }
 0x122   :  { %913 = vrcp.f32 %v417_v63  ;;  %v531_v22 = vmul.f32 1.442695, %v519_v32  ;;  %v529_v45 = vmul.f32 1.442695, %v518_v37  ;;  %vm555_vm4 = vcmp.lt.f32.partialorder %v1117_v14, 0.0 }
 0x123   :  { %915 = vpow2.f32 %v525_v13  ;;  %v517_v48 = vmul.f32 %v509_v54, %v397_v53  ;;  %v537_v5 = vmul.f32 1.442695, %v522_v50  ;;  %vm558_vm5 = vcmp.lt.f32.partialorder %v1132_v41, 0.0 }
 0x124   :  { %917 = vpow2.f32 %v533_v15  ;;  %vm562_vm6 = vcmp.lt.f32.partialorder %v1137_v46, 0.0  ;;  %vm559_vm7 = vcmp.lt.f32.partialorder %v1121_v16, 0.0  ;;  %vm557_vm8 = vcmp.lt.f32.partialorder %v1140_v47, 0.0 }
 0x125   :  { %919 = vpow2.f32 %v523_v58  ;;  %v381_v8 = vmul.f32 0.5, %v1129_v40  ;;  %vm561_vm9 = vcmp.lt.f32.partialorder %v1146_v52, 0.0  ;;  %v385_v47 = vmul.f32 0.5, %v1134_v42 }
 0x126   :  { %v1149_v60 = vpop.eup %899  ;;  %921 = vpow2.f32 %v531_v22  ;;  %v384_v52 = vmul.f32 0.5, %v1103_v6  ;;  %v383_v42 = vmul.f32 0.5, %v1113_v12  ;;  %v603_v12 = vpop.permute.xlu1 %602 }
 0x127   :  { %v1151_v62 = vpop.eup %901  ;;  %v436_v0 = vmul.f32 1.0614054, %v1149_v60  ;;  %923 = vpow2.f32 %v529_v45 }
 0x128   :  { %v440_v3 = vmul.f32 1.0614054, %v1151_v62  ;;  %v1155_v10 = vpop.eup %903  ;;  %925 = vpow2.f32 %v537_v5 }
 0x129   :  { %v444_v7 = vadd.f32 -1.4531521, %v436_v0  ;;  %v435_v24 = vmul.f32 1.0614054, %v1155_v10  ;;  %v1159_v28 = vpop.eup %905 }
 0x12a   :  { %v448_v20 = vadd.f32 -1.4531521, %v440_v3  ;;  %v439_v36 = vmul.f32 1.0614054, %v1159_v28 }
 0x12b   :  { %v452_v23 = vmul.f32 %v1149_v60, %v444_v7  ;;  %v443_v35 = vadd.f32 -1.4531521, %v435_v24  ;;  %v1167_v1 = vpop.eup %907 }
 0x12c   :  { %v456_v31 = vmul.f32 %v1151_v62, %v448_v20  ;;  %v447_v57 = vadd.f32 -1.4531521, %v439_v36  ;;  %v1169_v3 = vpop.eup %909  ;;  %v438_v7 = vmul.f32 1.0614054, %v1167_v1  ;;  %v521_v20 = vmul.f32 %v513_v19, %v401_v55 }
 0x12d   :  { %v460_v33 = vadd.f32 1.4214138, %v452_v23  ;;  %v451_v56 = vmul.f32 %v1155_v10, %v443_v35  ;;  %v442_v21 = vmul.f32 1.0614054, %v1169_v3  ;;  %v1176_v30 = vpop.eup %911 }
 0x12e   :  { %v464_v51 = vadd.f32 1.4214138, %v456_v31  ;;  %v455_v0 = vmul.f32 %v1159_v28, %v447_v57  ;;  %v446_v24 = vadd.f32 -1.4531521, %v438_v7  ;;  %v527_v31 = vmul.f32 1.442695, %v517_v48 }
 0x12f   :  { %v468_v49 = vmul.f32 %v1149_v60, %v460_v33  ;;  %v459_v63 = vadd.f32 1.4214138, %v451_v56  ;;  %v450_v32 = vadd.f32 -1.4531521, %v442_v21  ;;  %v437_v55 = vmul.f32 1.0614054, %v1176_v30  ;;  %v1182_v15 = vpop.eup %913 }
 0x130   :  { %v472_v59 = vmul.f32 %v1151_v62, %v464_v51  ;;  %v463_v18 = vadd.f32 1.4214138, %v455_v0  ;;  %v454_v35 = vmul.f32 %v1167_v1, %v446_v24  ;;  %v535_v37 = vmul.f32 1.442695, %v521_v20 }
 0x131   :  { %v476_v61 = vadd.f32 -0.28449672, %v468_v49  ;;  %v467_v17 = vmul.f32 %v1155_v10, %v459_v63  ;;  %v458_v54 = vmul.f32 %v1169_v3, %v450_v32  ;;  %v445_v56 = vadd.f32 -1.4531521, %v437_v55 }
 0x132   :  { %v480_v2 = vadd.f32 -0.28449672, %v472_v59  ;;  %v471_v53 = vmul.f32 %v1159_v28, %v463_v18  ;;  %v462_v49 = vadd.f32 1.4214138, %v454_v35  ;;  %v441_v57 = vmul.f32 1.0614054, %v1182_v15 }
 0x133   :  { %v484_v23 = vmul.f32 %v1149_v60, %v476_v61  ;;  %v475_v13 = vadd.f32 -0.28449672, %v467_v17  ;;  %927 = vpow2.f32 %v527_v31  ;;  %v466_v58 = vadd.f32 1.4214138, %v458_v54 }
 0x134   :  { %v488_v33 = vmul.f32 %v1151_v62, %v480_v2  ;;  %v479_v50 = vadd.f32 -0.28449672, %v471_v53  ;;  %v470_v22 = vmul.f32 %v1167_v1, %v462_v49  ;;  %v453_v61 = vmul.f32 %v1176_v30, %v445_v56  ;;  %v916_v2 = vpop.eup %915 }
 0x135   :  { %v483_v36 = vmul.f32 %v1155_v10, %v475_v13  ;;  %v492_v51 = vadd.f32 0.2548296, %v484_v23  ;;  %v449_v63 = vadd.f32 -1.4531521, %v441_v57  ;;  %929 = vpow2.f32 %v535_v37  ;;  %v918_v23 = vpop.eup %917 }
 0x136   :  { %v496_v19 = vadd.f32 0.2548296, %v488_v33  ;;  %v487_v59 = vmul.f32 %v1159_v28, %v479_v50  ;;  %v474_v45 = vmul.f32 %v1169_v3, %v466_v58  ;;  %v478_v5 = vadd.f32 -0.28449672, %v470_v22  ;;  %v920_v33 = vpop.eup %919 }
 0x137   :  { %v491_v0 = vadd.f32 0.2548296, %v483_v36  ;;  %v500_v48 = vmul.f32 %v1149_v60, %v492_v51  ;;  %v461_v7 = vadd.f32 1.4214138, %v453_v61  ;;  %v457_v17 = vmul.f32 %v1182_v15, %v449_v63  ;;  %v922_v54 = vpop.eup %921 }
 0x138   :  { %v495_v18 = vadd.f32 0.2548296, %v487_v59  ;;  %v482_v20 = vadd.f32 -0.28449672, %v474_v45  ;;  %v504_v21 = vmul.f32 %v1151_v62, %v496_v19  ;;  %v486_v24 = vmul.f32 %v1167_v1, %v478_v5  ;;  %v924_v50 = vpop.eup %923 }
 0x139   :  { %v469_v13 = vmul.f32 %v1176_v30, %v461_v7  ;;  %v465_v53 = vadd.f32 1.4214138, %v457_v17  ;;  %v499_v31 = vmul.f32 %v1155_v10, %v491_v0  ;;  %v540_v60 = vmul.f32 %v916_v2, %v500_v48  ;;  %v926_v58 = vpop.eup %925 }
 0x13a   :  { %v490_v32 = vmul.f32 %v1169_v3, %v482_v20  ;;  %v494_v35 = vadd.f32 0.2548296, %v486_v24  ;;  %v503_v37 = vmul.f32 %v1159_v28, %v495_v18  ;;  %v544_v51 = vmul.f32 %v918_v23, %v504_v21 }
 0x13b   :  { %v477_v55 = vadd.f32 -0.28449672, %v469_v13  ;;  %v473_v36 = vmul.f32 %v1182_v15, %v465_v53  ;;  %v539_v10 = vmul.f32 %v920_v33, %v499_v31  ;;  %v548_v59 = vsub.f32 1.0, %v540_v60 }
 0x13c   :  { %v498_v62 = vadd.f32 0.2548296, %v490_v32  ;;  %v502_v49 = vmul.f32 %v1167_v1, %v494_v35  ;;  %v543_v0 = vmul.f32 %v922_v54, %v503_v37  ;;  %v552_v45 = vsub.f32 1.0, %v544_v51 }
 0x13d   :  { %v485_v56 = vmul.f32 %v1176_v30, %v477_v55  ;;  %v481_v57 = vadd.f32 -0.28449672, %v473_v36  ;;  %v547_v7 = vsub.f32 1.0, %v539_v10  ;;  %v564_v18 = vsub.f32 0.0, %v548_v59 }
 0x13e   :  { %v506_v19 = vmul.f32 %v1169_v3, %v498_v62  ;;  %v542_v22 = vmul.f32 %v924_v50, %v502_v49  ;;  %v382_v3 = vmul.f32 0.5, %v1125_v38  ;;  %v551_v13 = vsub.f32 1.0, %v543_v0 }
 0x13f   :  { %v493_v61 = vadd.f32 0.2548296, %v485_v56  ;;  %v489_v63 = vmul.f32 %v1182_v15, %v481_v57  ;;  %v563_v33 = vsub.f32 0.0, %v547_v7  ;;  %v386_v38 = vmul.f32 0.5, %v1127_v39 }
 0x140   :  { %v546_v28 = vmul.f32 %v926_v58, %v506_v19  ;;  %v928_v1 = vpop.eup %927  ;;  %v550_v48 = vsub.f32 1.0, %v542_v22  ;;  %v572_v36 = vsel %vm556_vm2, %v564_v18, %v548_v59  ;;  %v567_v62 = vsub.f32 0.0, %v551_v13 }
 0x141   :  { %v501_v2 = vmul.f32 %v1176_v30, %v493_v61  ;;  %v497_v5 = vadd.f32 0.2548296, %v489_v63  ;;  %v568_v30 = vsub.f32 0.0, %v552_v45  ;;  %v571_v49 = vsel %vm555_vm4, %v563_v33, %v547_v7 }
 0x142   :  { %v554_v17 = vsub.f32 1.0, %v546_v28  ;;  %v930_v20 = vpop.eup %929  ;;  %v566_v21 = vsub.f32 0.0, %v550_v48  ;;  %v580_v57 = vadd.f32 1.0, %v572_v36  ;;  %v380_v10 = vmul.f32 0.5, %v1101_v4  ;;  %v155_v28 = vld [vmem:[%s1269_s1 + $0x28] sm:$0xff] }
 0x143   :  { %v541_v23 = vmul.f32 %v928_v1, %v501_v2  ;;  %v505_v24 = vmul.f32 %v1182_v15, %v497_v5  ;;  %v576_v46 = vsel %vm560_vm3, %v568_v30, %v552_v45  ;;  %v575_v58 = vsel %vm559_vm7, %v567_v62, %v551_v13  ;;  %v598_v1 = vpop.permute.xlu0 %597  ;;  %v813_v2 = vld [vmem:[%s1271_s3 + $0x2] ss:$0 sm:$0xff] }
 0x144   :  { %v570_v53 = vsub.f32 0.0, %v554_v17  ;;  %v574_v31 = vsel %vm558_vm5, %v566_v21, %v550_v48  ;;  %v584_v59 = vadd.f32 1.0, %v576_v46  ;;  %v579_v40 = vadd.f32 1.0, %v571_v49 }
 0x145   :  { %v549_v32 = vsub.f32 1.0, %v541_v23  ;;  %v545_v60 = vmul.f32 %v930_v20, %v505_v24  ;;  %v582_v35 = vadd.f32 1.0, %v574_v31  ;;  %v379_v22 = vmul.f32 0.5, %v1108_v9  ;;  %v157_v9 = vld [vmem:[%s1269_s1 + $0x58] sm:$0xff] }
 0x146   :  { %v578_v55 = vsel %vm562_vm6, %v570_v53, %v554_v17  ;;  %v588_v4 = vmul.f32 %v580_v57, %v380_v10  ;;  %v583_v63 = vadd.f32 1.0, %v575_v58  ;;  %v592_v16 = vmul.f32 %v584_v59, %v384_v52 }
 0x147   :  { %v586_v37 = vadd.f32 1.0, %v578_v55  ;;  %v565_v15 = vsub.f32 0.0, %v549_v32  ;;  %v553_v54 = vsub.f32 1.0, %v545_v60  ;;  %v590_v41 = vmul.f32 %v582_v35, %v382_v3 }
 0x148   :  { %v587_v0 = vmul.f32 %v579_v40, %v379_v22  ;;  %v591_v6 = vmul.f32 %v583_v63, %v383_v42  ;;  %v108_v3 = vmul.f32 %v1041_v27, %v1035_v25  ;;  %v109_v21 = vmul.f32 %v1046_v29, %v1037_v26 }
 0x149   :  { %v594_v51 = vmul.f32 %v586_v37, %v386_v38  ;;  %v573_v50 = vsel %vm557_vm8, %v565_v15, %v549_v32  ;;  %v569_v39 = vsub.f32 0.0, %v553_v54  ;;  %870 = vmatprep.subr.mxu0 %v590_v41 }
 0x14a   :  { %v581_v56 = vadd.f32 1.0, %v573_v50  ;;  %871 = vmatpush3.msra.mxu0 %v590_v41 }
 0x14b   :  { %881 = vmatprep.subr.mxu1 %v594_v51  ;;  %v577_v11 = vsel %vm561_vm9, %v569_v39, %v553_v54 }
 0x14c   :  { %882 = vmatpush3.msra.mxu1 %v594_v51  ;;  %v589_v14 = vmul.f32 %v581_v56, %v381_v8  ;;  %v585_v19 = vadd.f32 1.0, %v577_v11 }
 0x14e   :  { %872 = vmatprep.subr.mxu0 %v589_v14  ;;  %v593_v61 = vmul.f32 %v585_v19, %v385_v47 }
 0x14f   :  { %873 = vmatpush3.msra.mxu0 %v589_v14 }
 0x150   :  { %883 = vmatprep.subr.mxu1 %v593_v61  ;;  %874 = vmatprep.subr.mxu0 %v588_v4 }
 0x151   :  { %884 = vmatpush3.msra.mxu1 %v593_v61  ;;  %875 = vmatpush3.msra.mxu0 %v588_v4 }
 0x152   :  { %885 = vmatprep.subr.mxu1 %v592_v16  ;;  %876 = vmatprep.subr.mxu0 %v587_v0 }
 0x153   :  { %886 = vmatpush3.msra.mxu1 %v592_v16  ;;  %877 = vmatpush3.msra.mxu0 %v587_v0 }
 0x154   :  { %887 = vmatprep.subr.mxu1 %v591_v6  ;;  %879 = vmatmul.mubr.msk.f32.vlgmr.msra.gmra.mxu0 %vm184_vm1, %v155_v28 }
 0x155   :  { %888 = vmatpush3.msra.mxu1 %v591_v6 }
 0x156   :  { %890 = vmatmul.mubr.msk.f32.vlgmr.msra.gmra.mxu1 %vm184_vm1, %v157_v9 }
 0x214   :  { %v880_v45 = vpop.f32.mrf.mxu0 }
 0x215   :  { %v683_v48 = vadd.f32 %v880_v45, %v603_v12 }
 0x216   :  { %v891_v5 = vpop.f32.mrf.mxu1  ;;  %v677_v7 = vpop.f32.mrf.mxu0 }
 0x217   :  { %v768_v17 = vsub.f32 %v683_v48, %v1055_v34  ;;  %v764_v18 = vadd.f32 %v891_v5, %v603_v12  ;;  %v678_v20 = vadd.f32 %v677_v7, %v598_v1 }
 0x218   :  { %v758_v23 = vpop.f32.mrf.mxu1 }
 0x219   :  { %v778_v24 = vmul.f32 %v813_v2, %v768_v17  ;;  %v770_v13 = vsub.f32 %v764_v18, %v1055_v34  ;;  %v767_v53 = vsub.f32 %v678_v20, %v1055_v34  ;;  %v759_v30 = vadd.f32 %v758_v23, %v598_v1 }
 0x21b   :  { %v782_v31 = vmul.f32 %v778_v24, %v108_v3  ;;  %v780_v32 = vmul.f32 %v813_v2, %v770_v13  ;;  %v777_v60 = vmul.f32 %v813_v2, %v767_v53  ;;  %v769_v33 = vsub.f32 %v759_v30, %v1055_v34 }
 0x21d   :  { %v786_v25 = vadd.f32 %v782_v31, %v1015_v43  ;;  %v784_v27 = vmul.f32 %v780_v32, %v109_v21  ;;  %v781_v38 = vmul.f32 %v777_v60, %v108_v3  ;;  %v779_v35 = vmul.f32 %v813_v2, %v769_v33 }
 0x21f   :  { %790 = vst.msk [vmem:[%s1272_s4 + $0x8] sm:$0xff] %vm30_vm0, %v786_v25  ;;  %v788_v26 = vadd.f32 %v784_v27, %v1017_v44  ;;  %v785_v29 = vadd.f32 %v781_v38, %v1015_v43  ;;  %v783_v55 = vmul.f32 %v779_v35, %v109_v21 }
 0x221   :  { %792 = vst.msk [vmem:[%s1272_s4 + $0x18] sm:$0xff] %vm30_vm0, %v788_v26  ;;  %789 = vst.msk [vmem:[%s1272_s4] sm:$0xff] %vm30_vm0, %v785_v29  ;;  %v787_v34 = vadd.f32 %v783_v55, %v1017_v44 }
 0x223   :  { %791 = vst.msk [vmem:[%s1272_s4 + $0x10] sm:$0xff] %vm30_vm0, %v787_v34 }

</bundles_post_ra>
